<compile_context>
chip_gen: v5e
topology: v5e:2x2
jax: 0.10.0
libtpu: 0.0.40
codegen_flags: <defaults>
</compile_context>

<pallas_src>
import math

import jax
import jax.numpy as jnp
from jax.experimental import pallas as pl
from jax.experimental.pallas import tpu as pltpu


_LANES = 128      # lane width: keep the packed-parameter axis a multiple of this
_SUBLANES = 8     # sublane granularity for the contraction axis


def _round_up(n, m):
    return ((n + m - 1) // m) * m


# ----------------------------- Pallas kernel -------------------------------

def cpg_generate_kernel(x_ref, wt_ref, o_ref):
    # x_ref : (K_pad, 1)     f32 VMEM  -- context as a sublane-oriented column
    # wt_ref: (K_pad, N_pad) f32 VMEM  -- transposed, zero-padded generator weight
    # o_ref : (1, N_pad)     f32 VMEM  -- packed generated parameters (lane-dense)
    #
    # Single-context path: VPU lane-broadcast multiply + cross-sublane reduce.
    prod = x_ref[...] * wt_ref[...]                    # (K_pad, N_pad)
    o_ref[...] = jnp.sum(prod, axis=0, keepdims=True)  # (1, N_pad)


def cpg_generate_packed(x_col, cpg_weight_t_padded):
    """packed = (x @ Wt) zero-padded to a lane-dense (1, N_pad) vector."""
    _, n_pad = cpg_weight_t_padded.shape
    return pl.pallas_call(
        cpg_generate_kernel,
        out_shape=jax.ShapeDtypeStruct((1, n_pad), jnp.float32),
        # Whole arrays (a few KiB) live in VMEM; no grid, no pipelining needed.
        in_specs=[
            pl.BlockSpec(memory_space=pltpu.MemorySpace.VMEM),
            pl.BlockSpec(memory_space=pltpu.MemorySpace.VMEM),
        ],
        out_specs=pl.BlockSpec(memory_space=pltpu.MemorySpace.VMEM),
    )(x_col, cpg_weight_t_padded)


# ------------------------------ CPG wrapper --------------------------------

class CPGPallas:
    """JAX/Pallas port of the CPG module.

    The base module is a Linear(8 -> 16, bias=True); its parameters
    ("weight" (16, 8) and "bias" (16,)) are the generation targets
    (matching filter_func = requires_grad).
    """

    def __init__(self, input_size, param_shapes, key):
        self.input_size = int(input_size)
        self.param_names = list(param_shapes.keys())
        self.param_shapes = {n: tuple(s) for n, s in param_shapes.items()}

        # Static (Python-int) offsets for the per-parameter split.
        self.param_meta = []
        start = 0
        for name in self.param_names:
            shape = self.param_shapes[name]
            numel = int(math.prod(shape))
            self.param_meta.append((name, shape, start, numel))
            start += numel
        self.total_numels = start

        self.padded_input_size = _round_up(self.input_size, _SUBLANES)
        self.padded_numels = _round_up(self.total_numels, _LANES)

        # nn.Linear(input_size, total_numels, bias=False) weight has shape
        # (total_numels, input_size), default init U(-1/sqrt(K), 1/sqrt(K)).
        # Stored transposed (K, N) for the kernel, then zero-padded to
        # (K_pad, N_pad) so the output is lane-dense; the pad columns are
        # zero and are sliced off before the per-parameter split.
        bound = 1.0 / math.sqrt(self.input_size)
        w = jax.random.uniform(
            key, (self.total_numels, self.input_size),
            minval=-bound, maxval=bound, dtype=jnp.float32,
        )
        self.cpg_weight_t = jnp.transpose(w)  # (K, N) unpadded (for reference)
        self.cpg_weight_t_padded = (
            jnp.zeros((self.padded_input_size, self.padded_numels), jnp.float32)
            .at[: self.input_size, : self.total_numels]
            .set(self.cpg_weight_t)
        )

    def __call__(self, cpg_inputs):
        """Forward: generate and return the base-module parameters."""
        x = cpg_inputs.astype(jnp.float32)
        if self.padded_input_size != self.input_size:
            x = jnp.pad(x, (0, self.padded_input_size - self.input_size))
        x_col = x.reshape(self.padded_input_size, 1)  # sublane-oriented column

        packed = cpg_generate_packed(x_col, self.cpg_weight_t_padded)
        flat = packed[0]  # (padded_numels,)

        generated = {}
        for name, shape, start, numel in self.param_meta:
            # torch.narrow(all_weights, -1, start, numel).reshape(shape),
            # using static Python slices (fuse into the XLA graph).
            generated[name] = flat[start:start + numel].reshape(shape)
        return generated


# ------------------------------- reference ---------------------------------

def cpg_ref(cpg_inputs, cpg_weight_t, param_shapes):
    all_weights = cpg_inputs @ cpg_weight_t  # (total_numels,)
    out = {}
    start = 0
    for name, shape in param_shapes.items():
        numel = int(math.prod(shape))
        out[name] = all_weights[start:start + numel].reshape(shape)
        start += numel
    return out


# --------------------------------- main -------------------------------------

if __name__ == "__main__":
    input_size = 32
    # Base module: nn.Linear(8, 16) -> params "weight" (16, 8), "bias" (16,)
    param_shapes = {"weight": (16, 8), "bias": (16,)}

    key = jax.random.PRNGKey(0)
    k_w, k_x = jax.random.split(key)

    cpg = CPGPallas(input_size, param_shapes, k_w)
    cpg_inputs = jax.random.normal(k_x, (input_size,), dtype=jnp.float32)

    generated = cpg(cpg_inputs)
    generated = jax.block_until_ready(generated)

    # Verify against the plain-JAX reference of the PyTorch semantics.
    ref = cpg_ref(cpg_inputs, cpg.cpg_weight_t, param_shapes)
    for name in param_shapes:
        assert generated[name].shape == tuple(param_shapes[name])
        assert jnp.allclose(generated[name], ref[name], atol=1e-5, rtol=1e-5)

    print("KERNEL_OK")
</pallas_src>

<mosaic_0001>
module attributes {stable_mosaic.version = 11 : i64} {
  func.func @cpg_generate_kernel(%arg0: memref<32x1xf32, #tpu.memory_space<vmem>>, %arg1: memref<32x256xf32, #tpu.memory_space<vmem>>, %arg2: memref<1x256xf32, #tpu.memory_space<vmem>>) attributes {dimension_semantics = [], scalar_prefetch = 0 : i64, scratch_operands = 0 : i64, tpu.core_type = #tpu.core_type<tc>} {
    %c0 = arith.constant 0 : index
    %c0_0 = arith.constant 0 : index
    %0 = vector.load %arg0[%c0, %c0_0] : memref<32x1xf32, #tpu.memory_space<vmem>>, vector<32x1xf32>
    %c0_1 = arith.constant 0 : index
    %c0_2 = arith.constant 0 : index
    %1 = vector.load %arg1[%c0_1, %c0_2] : memref<32x256xf32, #tpu.memory_space<vmem>>, vector<32x256xf32>
    %2 = vector.broadcast %0 : vector<32x1xf32> to vector<32x256xf32>
    %3 = arith.mulf %2, %1 : vector<32x256xf32>
    %cst = arith.constant dense<0.000000e+00> : vector<256xf32>
    %4 = vector.multi_reduction <add>, %3, %cst [0] : vector<32x256xf32> to vector<256xf32>
    %5 = vector.shape_cast %4 : vector<256xf32> to vector<1x256xf32>
    %c0_3 = arith.constant 0 : index
    %c0_4 = arith.constant 0 : index
    %6 = vector.load %arg2[%c0_3, %c0_4] : memref<1x256xf32, #tpu.memory_space<vmem>>, vector<1x256xf32>
    tpu.vector_store %arg2[%c0_3, %c0_4], %5 {strides = array<i32>} : memref<1x256xf32, #tpu.memory_space<vmem>>, vector<1x256xf32>,
    return
  }
}

</mosaic_0001>

<bundles_post_ra>
// kernel: tpu_custom_call.1
= control target key start
LH: loop header
LB: loop body
LE: loop exit
PB: predicated region body
PF: predicated region fallthrough
CT: control target
= control target key end

     0   :  { %7 = vsyncpa [#allocation3], 0  ;;  %s211_s0 = inlined_call_operand.vmem [shape: f32[32,1], index: 0, kind: input, shape index: {}]   ;;  %s212_s1 = inlined_call_operand.hbm [shape: f32[32,256], index: 1, kind: input, shape index: {}]   ;;  %s213_s2 = inlined_call_operand.hbm [shape: f32[1,256], index: 2, kind: output, shape index: {}]  }
   0x1   :  { %8 = vsyncpa [#allocation4], 0  ;;  %s15_s11 = sshll.u32 %s212_s1, 4  ;;  %s173_s12 = smov [#allocation2]   ;;  %s16_s11 = int_to_ptr.hbm [resolvable:$true] %s15_s11 }
   0x2   :  { %s17_s13 = sshll.u32 %s173_s12, 4  ;;  %s174_s14 = smov 256   ;;  %s18_s13 = int_to_ptr.vmem [resolvable:$true] %s17_s13 }
   0x3   :  { %s175_s15 = smov 16  }
   0x4   :  { %23 = dma.hbm_to_vmem [thread:$0]  %s16_s11, 1024, %s18_s13, [#allocation3], %s174_s14, %s174_s14, %s175_s15  }
   0x5   :  { %169 = dma.done.wait [#allocation3], 1024  }
   0x6   :  { %170 = vsyncadd [#allocation3], 4294966272  ;;  %v176_v0 = vmov 0   ;;  %v30_v1 = vld [vmem:[%s211_s0 + $0x10] sm:$0xff]  ;;  %v28_v2 = vld [vmem:[%s211_s0] sm:$0xff]  ;;  %v92_v41 = vlaneseq  ;;  %s104_s26 = sshll.u32 %s213_s2, 4  ;;  %s105_s26 = int_to_ptr.hbm [resolvable:$true] %s104_s26 }
   0x7   :  { %120 = vset.pattern.permute.xlu1 %v176_v0  ;;  %119 = vset.pattern.permute.xlu0 %v176_v0  ;;  %v31_v3 = vld [vmem:[%s211_s0 + $0x18] sm:$0xff]  ;;  %v29_v4 = vld [vmem:[%s211_s0 + $0x8] sm:$0xff]  ;;  %v32_v7 = vld [vmem:[#allocation2] sm:$0xff]  ;;  %s177_s0 = smov [#allocation5]   ;;  %vm89_vm0 = vcmask 1040384  }
   0x8   :  { %52 = vperm.xlu1 %120, %v30_v1   ;;  %42 = vperm.xlu0 %119, %v28_v2   ;;  %v33_v8 = vld [vmem:[#allocation2 + $0x8] sm:$0xff]  ;;  %v34_v9 = vld [vmem:[#allocation2 + $0x10] sm:$0xff]  ;;  %v35_v10 = vld [vmem:[#allocation2 + $0x18] sm:$0xff]  ;;  %s102_s23 = sshll.u32 %s177_s0, 4  ;;  %vm94_vm1 = vcmp.lt.s32.totalorder %v92_v41, 256  ;;  %s103_s23 = int_to_ptr.vmem [resolvable:$true] %s102_s23 }
   0x9   :  { %v36_v11 = vld [vmem:[#allocation2 + $0x20] sm:$0xff]  ;;  %v37_v12 = vld [vmem:[#allocation2 + $0x28] sm:$0xff]  ;;  %v38_v18 = vld [vmem:[#allocation2 + $0x30] sm:$0xff] }
   0xa   :  { %v39_v19 = vld [vmem:[#allocation2 + $0x38] sm:$0xff] }
  0x10   :  { %57 = vperm.xlu1 %120, %v31_v3   ;;  %47 = vperm.xlu0 %119, %v29_v4  }
  0x7a   :  { %v53_v5 = vpop.permute.xlu1 %52  ;;  %v43_v6 = vpop.permute.xlu0 %42 }
  0x7b   :  { %v60_v14 = vmul.f32 %v43_v6, %v32_v7  ;;  %v61_v15 = vmul.f32 %v43_v6, %v33_v8  ;;  %v64_v21 = vmul.f32 %v53_v5, %v36_v11  ;;  %v65_v22 = vmul.f32 %v53_v5, %v37_v12 }
  0x82   :  { %v48_v13 = vpop.permute.xlu0 %47  ;;  %v58_v20 = vpop.permute.xlu1 %57 }
  0x83   :  { %v62_v16 = vmul.f32 %v48_v13, %v34_v9  ;;  %v63_v17 = vmul.f32 %v48_v13, %v35_v10  ;;  %v66_v25 = vmul.f32 %v58_v20, %v38_v18  ;;  %v67_v26 = vmul.f32 %v58_v20, %v39_v19 }
  0x85   :  { %v68_v23 = vadd.f32 %v62_v16, %v60_v14  ;;  %v77_v24 = vadd.f32 %v63_v17, %v61_v15 }
  0x87   :  { %v69_v27 = vadd.f32 %v68_v23, %v64_v21  ;;  %v78_v28 = vadd.f32 %v77_v24, %v65_v22 }
  0x89   :  { %v70_v29 = vadd.f32 %v69_v27, %v66_v25  ;;  %v79_v30 = vadd.f32 %v78_v28, %v67_v26 }
  0x8b   :  { %v71_v31 = vrot.slane %v70_v29, 4  ;;  %v80_v32 = vrot.slane %v79_v30, 4 }
  0x8d   :  { %v72_v33 = vadd.f32 %v71_v31, %v70_v29  ;;  %v81_v34 = vadd.f32 %v80_v32, %v79_v30 }
  0x8f   :  { %v73_v35 = vrot.slane %v72_v33, 2  ;;  %v82_v36 = vrot.slane %v81_v34, 2 }
  0x91   :  { %v74_v37 = vadd.f32 %v73_v35, %v72_v33  ;;  %v83_v38 = vadd.f32 %v82_v36, %v81_v34 }
  0x93   :  { %v84_v39 = vrot.slane %v83_v38, 1  ;;  %v75_v40 = vrot.slane %v74_v37, 1 }
  0x95   :  { %v85_v42 = vadd.f32 %v84_v39, %v83_v38  ;;  %v76_v43 = vadd.f32 %v75_v40, %v74_v37 }
  0x97   :  { %v88_v44 = vrot.slane %v85_v42, 7 }
  0x99   :  { %v90_v45 = vsel %vm89_vm0, %v76_v43, %v88_v44 }
  0x9a   :  { %96 = vst.msk [vmem:[#allocation5] sm:$0x3] %vm94_vm1, %v90_v45 }
  0x9b   :  { %107 = dma.vmem_to_hbm [thread:$0]  %s103_s23, 32, %s105_s26, [#allocation4]  }
  0x9c   :  { %171 = dma.done.wait [#allocation4], 32  }
  0x9d   :  { %172 = vsyncadd [#allocation4], 4294967264 }
  0x9e   :  { %112 = vsyncpa [#allocation3], 1 }
  0x9f   :  { %113 = vsyncpa [#allocation4], 1 }

</bundles_post_ra>
